<compile_context>
chip_gen: v6e
topology: v6e:2x2x1
jax: 0.10.0
libtpu: 0.0.40
codegen_flags: <defaults>
</compile_context>

<pallas_src>
import functools

import jax
import jax.numpy as jnp
from jax.experimental import pallas as pl
from jax.experimental.pallas import tpu as pltpu


def _round_up(x, m):
    return ((x + m - 1) // m) * m


def _mlp_kernel(num_hidden, *refs):
    """Fused MLP kernel for one batch tile.

    refs layout:
      xi_ref, xj_ref,                     # (tile_n, emb_dim) bf16
      (w_ref, b_ref) * num_hidden,        # hidden layers: w (emb, emb) bf16, b (1, emb) f32
      w_out_ref, b_out_ref,               # final layer:   w (emb, out) bf16, b (1, out) f32
      out_ref                             # (tile_n, out_dim) f32
    """
    xi_ref, xj_ref = refs[0], refs[1]
    out_ref = refs[-1]
    layer_refs = refs[2:-1]

    # Hadamard product of the two embeddings; kept in bf16 for the MXU.
    x = xi_ref[...] * xj_ref[...]

    # Hidden layers: bf16 matmul on the MXU with f32 accumulation, bias + ReLU on VPU.
    for h in range(num_hidden):
        w_ref = layer_refs[2 * h]
        b_ref = layer_refs[2 * h + 1]
        acc = jnp.dot(x, w_ref[...], preferred_element_type=jnp.float32) + b_ref[...]
        # dropout(p, training=False) == identity
        x = jnp.maximum(acc, 0.0).astype(xi_ref.dtype)  # back to bf16 for the next MXU pass

    # Output layer + sigmoid (EUP), f32 accumulation / output.
    w_out_ref = layer_refs[-2]
    b_out_ref = layer_refs[-1]
    score = jnp.dot(x, w_out_ref[...], preferred_element_type=jnp.float32) + b_out_ref[...]
    out_ref[...] = jax.nn.sigmoid(score).astype(out_ref.dtype)


def mlp_forward(x_i, x_j, weights, biases, *, tile_n=4096):
    """Run the fused MLP.

    weights[k]: (in_k, out_k) bf16 (already transposed vs. PyTorch at init time)
    biases[k]:  (1, out_k)    f32  (already reshaped at init time)
    x_i, x_j:   (N, emb_dim)  bf16
    """
    n, emb_dim = x_i.shape
    out_dim = weights[-1].shape[1]
    num_hidden = len(weights) - 1

    # Large batch tile (multiple of 8 sublanes), clamped for small batches.
    tile_n = min(tile_n, _round_up(n, 8))
    grid = (pl.cdiv(n, tile_n),)

    # Batch-tiled inputs/outputs: Pallas double-buffers these (DMA/compute overlap).
    x_spec = pl.BlockSpec((tile_n, emb_dim), lambda i: (i, 0))
    out_spec = pl.BlockSpec((tile_n, out_dim), lambda i: (i, 0))
    # NOTE: if profiling shows exposed DMA on x_i/x_j (per-tile compute is short),
    # deepen the pipeline with pipeline_mode=pl.Buffered(3) on these two specs.

    # Weights/biases: constant index_map -> fetched once, VMEM-resident across steps.
    flat_params = []
    param_specs = []
    for w, b in zip(weights, biases):
        flat_params += [w, b]
        param_specs += [
            pl.BlockSpec(w.shape, lambda i: (0, 0)),
            pl.BlockSpec(b.shape, lambda i: (0, 0)),
        ]

    kernel = functools.partial(_mlp_kernel, num_hidden)

    return pl.pallas_call(
        kernel,
        out_shape=jax.ShapeDtypeStruct((n, out_dim), jnp.float32),
        grid=grid,
        in_specs=[x_spec, x_spec] + param_specs,
        out_specs=out_spec,
        compiler_params=pltpu.CompilerParams(dimension_semantics=("parallel",)),
    )(x_i, x_j, *flat_params)


def init_params(key, emb_dim, out_dim, num_layers, *, param_dtype=jnp.bfloat16):
    """One-time parameter prep (hoisted out of the forward path).

    Deterministic synthetic init (uniform, roughly matching nn.Linear scale).
    Weights stored as (in, out) so the kernel computes x @ W; biases as (1, out) f32.
    """
    dims = [(emb_dim, emb_dim)] * (num_layers - 1) + [(emb_dim, out_dim)]
    weights, biases = [], []
    for d_in, d_out in dims:
        key, kw, kb = jax.random.split(key, 3)
        bound = float(1.0 / (d_in ** 0.5))
        w = jax.random.uniform(kw, (d_in, d_out), jnp.float32, -bound, bound)
        b = jax.random.uniform(kb, (d_out,), jnp.float32, -bound, bound)
        weights.append(w.astype(param_dtype))
        biases.append(b.reshape(1, -1))  # keep f32: added after f32 accumulation
    return weights, biases


def reference_forward(x_i, x_j, weights, biases):
    """Pure-JAX reference matching the PyTorch module in eval mode (same dtype flow)."""
    x = x_i * x_j
    for w, b in zip(weights[:-1], biases[:-1]):
        acc = jnp.dot(x, w, preferred_element_type=jnp.float32) + b
        x = jnp.maximum(acc, 0.0).astype(x_i.dtype)
    score = jnp.dot(x, weights[-1], preferred_element_type=jnp.float32) + biases[-1]
    return jax.nn.sigmoid(score)


if __name__ == "__main__":
    emb_dim = 32
    out_dim = 4
    num_layers = 3     # 2 hidden Linear(emb, emb) + final Linear(emb, out)
    batch = 256

    key = jax.random.PRNGKey(0)
    key, ki, kj, kp = jax.random.split(key, 4)
    x_i = jax.random.normal(ki, (batch, emb_dim), jnp.bfloat16)
    x_j = jax.random.normal(kj, (batch, emb_dim), jnp.bfloat16)
    weights, biases = init_params(kp, emb_dim, out_dim, num_layers)

    # Small tile in the demo so the grid actually iterates (4 steps); production
    # callers should keep the default tile_n=4096 to amortize per-step overhead.
    out = mlp_forward(x_i, x_j, weights, biases, tile_n=64)
    out = jax.block_until_ready(out)

    ref = reference_forward(x_i, x_j, weights, biases)
    assert out.shape == (batch, out_dim)
    assert jnp.allclose(out, ref, atol=5e-3, rtol=0), "mismatch vs reference"

    print("KERNEL_OK")
</pallas_src>

<mosaic_0001>
module attributes {stable_mosaic.version = 11 : i64} {
  func.func @_mlp_kernel(%arg0: i32, %arg1: memref<64x32xbf16, #tpu.memory_space<vmem>>, %arg2: memref<64x32xbf16, #tpu.memory_space<vmem>>, %arg3: memref<32x32xbf16, #tpu.memory_space<vmem>>, %arg4: memref<1x32xf32, #tpu.memory_space<vmem>>, %arg5: memref<32x32xbf16, #tpu.memory_space<vmem>>, %arg6: memref<1x32xf32, #tpu.memory_space<vmem>>, %arg7: memref<32x4xbf16, #tpu.memory_space<vmem>>, %arg8: memref<1x4xf32, #tpu.memory_space<vmem>>, %arg9: memref<64x4xf32, #tpu.memory_space<vmem>>) attributes {dimension_semantics = [#tpu.dimension_semantics<parallel>], iteration_bounds = array<i64: 4>, scalar_prefetch = 0 : i64, scratch_operands = 0 : i64, tpu.core_type = #tpu.core_type<tc>, window_params = [{transform_indices = @transform_0, window_bounds = array<i64: 64, 32>}, {transform_indices = @transform_1, window_bounds = array<i64: 64, 32>}, {pipeline_mode = #tpu.pipeline_mode<synchronous>, transform_indices = @transform_2, window_bounds = array<i64: 32, 32>}, {pipeline_mode = #tpu.pipeline_mode<synchronous>, transform_indices = @transform_3, window_bounds = array<i64: 1, 32>}, {pipeline_mode = #tpu.pipeline_mode<synchronous>, transform_indices = @transform_4, window_bounds = array<i64: 32, 32>}, {pipeline_mode = #tpu.pipeline_mode<synchronous>, transform_indices = @transform_5, window_bounds = array<i64: 1, 32>}, {pipeline_mode = #tpu.pipeline_mode<synchronous>, transform_indices = @transform_6, window_bounds = array<i64: 32, 4>}, {pipeline_mode = #tpu.pipeline_mode<synchronous>, transform_indices = @transform_7, window_bounds = array<i64: 1, 4>}, {transform_indices = @transform_8, window_bounds = array<i64: 64, 4>}]} {
    %c0 = arith.constant 0 : index
    %c0_0 = arith.constant 0 : index
    %0 = vector.load %arg1[%c0, %c0_0] : memref<64x32xbf16, #tpu.memory_space<vmem>>, vector<64x32xbf16>
    %c0_1 = arith.constant 0 : index
    %c0_2 = arith.constant 0 : index
    %1 = vector.load %arg2[%c0_1, %c0_2] : memref<64x32xbf16, #tpu.memory_space<vmem>>, vector<64x32xbf16>
    %2 = arith.mulf %0, %1 : vector<64x32xbf16>
    %c0_3 = arith.constant 0 : index
    %c0_4 = arith.constant 0 : index
    %3 = vector.load %arg3[%c0_3, %c0_4] : memref<32x32xbf16, #tpu.memory_space<vmem>>, vector<32x32xbf16>
    %cst = arith.constant dense<0.000000e+00> : vector<64x32xf32>
    %4 = tpu.matmul %2, %3, %cst {dimension_numbers = #tpu.dot_dimension_numbers<[1], [0], [0], [1], [0, 0, 1, 1], [], []>} : vector<64x32xbf16>, vector<32x32xbf16>, vector<64x32xf32> -> vector<64x32xf32>
    %c0_5 = arith.constant 0 : index
    %c0_6 = arith.constant 0 : index
    %5 = vector.load %arg4[%c0_5, %c0_6] : memref<1x32xf32, #tpu.memory_space<vmem>>, vector<1x32xf32>
    %6 = vector.broadcast %5 : vector<1x32xf32> to vector<64x32xf32>
    %7 = arith.addf %4, %6 : vector<64x32xf32>
    %cst_7 = arith.constant 0.000000e+00 : f32
    %8 = vector.broadcast %cst_7 : f32 to vector<64x32xf32>
    %9 = arith.maximumf %7, %8 : vector<64x32xf32>
    %10 = arith.truncf %9 : vector<64x32xf32> to vector<64x32xbf16>
    %c0_8 = arith.constant 0 : index
    %c0_9 = arith.constant 0 : index
    %11 = vector.load %arg5[%c0_8, %c0_9] : memref<32x32xbf16, #tpu.memory_space<vmem>>, vector<32x32xbf16>
    %cst_10 = arith.constant dense<0.000000e+00> : vector<64x32xf32>
    %12 = tpu.matmul %10, %11, %cst_10 {dimension_numbers = #tpu.dot_dimension_numbers<[1], [0], [0], [1], [0, 0, 1, 1], [], []>} : vector<64x32xbf16>, vector<32x32xbf16>, vector<64x32xf32> -> vector<64x32xf32>
    %c0_11 = arith.constant 0 : index
    %c0_12 = arith.constant 0 : index
    %13 = vector.load %arg6[%c0_11, %c0_12] : memref<1x32xf32, #tpu.memory_space<vmem>>, vector<1x32xf32>
    %14 = vector.broadcast %13 : vector<1x32xf32> to vector<64x32xf32>
    %15 = arith.addf %12, %14 : vector<64x32xf32>
    %cst_13 = arith.constant 0.000000e+00 : f32
    %16 = vector.broadcast %cst_13 : f32 to vector<64x32xf32>
    %17 = arith.maximumf %15, %16 : vector<64x32xf32>
    %18 = arith.truncf %17 : vector<64x32xf32> to vector<64x32xbf16>
    %c0_14 = arith.constant 0 : index
    %c0_15 = arith.constant 0 : index
    %19 = vector.load %arg7[%c0_14, %c0_15] : memref<32x4xbf16, #tpu.memory_space<vmem>>, vector<32x4xbf16>
    %cst_16 = arith.constant dense<0.000000e+00> : vector<64x4xf32>
    %20 = tpu.matmul %18, %19, %cst_16 {dimension_numbers = #tpu.dot_dimension_numbers<[1], [0], [0], [1], [0, 0, 1, 1], [], []>} : vector<64x32xbf16>, vector<32x4xbf16>, vector<64x4xf32> -> vector<64x4xf32>
    %c0_17 = arith.constant 0 : index
    %c0_18 = arith.constant 0 : index
    %21 = vector.load %arg8[%c0_17, %c0_18] : memref<1x4xf32, #tpu.memory_space<vmem>>, vector<1x4xf32>
    %22 = vector.broadcast %21 : vector<1x4xf32> to vector<64x4xf32>
    %23 = arith.addf %20, %22 : vector<64x4xf32>
    %24 = arith.negf %23 : vector<64x4xf32>
    %25 = math.exp %24 : vector<64x4xf32>
    %cst_19 = arith.constant 1.000000e+00 : f32
    %26 = vector.broadcast %cst_19 : f32 to vector<64x4xf32>
    %27 = arith.addf %26, %25 : vector<64x4xf32>
    %28 = arith.divf %26, %27 : vector<64x4xf32>
    %c0_20 = arith.constant 0 : index
    %c0_21 = arith.constant 0 : index
    %29 = vector.load %arg9[%c0_20, %c0_21] : memref<64x4xf32, #tpu.memory_space<vmem>>, vector<64x4xf32>
    tpu.vector_store %arg9[%c0_20, %c0_21], %28 {strides = array<i32>} : memref<64x4xf32, #tpu.memory_space<vmem>>, vector<64x4xf32>,
    return
  }
  func.func @transform_0(%arg0: i32) -> (i32, i32) {
    %c0_i32 = arith.constant 0 : i32
    %c0_i32_0 = arith.constant 0 : i32
    return %arg0, %c0_i32 : i32, i32
  }
  func.func @transform_1(%arg0: i32) -> (i32, i32) {
    %c0_i32 = arith.constant 0 : i32
    %c0_i32_0 = arith.constant 0 : i32
    return %arg0, %c0_i32 : i32, i32
  }
  func.func @transform_2(%arg0: i32) -> (i32, i32) {
    %c0_i32 = arith.constant 0 : i32
    %c0_i32_0 = arith.constant 0 : i32
    %c0_i32_1 = arith.constant 0 : i32
    return %c0_i32, %c0_i32_0 : i32, i32
  }
  func.func @transform_3(%arg0: i32) -> (i32, i32) {
    %c0_i32 = arith.constant 0 : i32
    %c0_i32_0 = arith.constant 0 : i32
    %c0_i32_1 = arith.constant 0 : i32
    return %c0_i32, %c0_i32_0 : i32, i32
  }
  func.func @transform_4(%arg0: i32) -> (i32, i32) {
    %c0_i32 = arith.constant 0 : i32
    %c0_i32_0 = arith.constant 0 : i32
    %c0_i32_1 = arith.constant 0 : i32
    return %c0_i32, %c0_i32_0 : i32, i32
  }
  func.func @transform_5(%arg0: i32) -> (i32, i32) {
    %c0_i32 = arith.constant 0 : i32
    %c0_i32_0 = arith.constant 0 : i32
    %c0_i32_1 = arith.constant 0 : i32
    return %c0_i32, %c0_i32_0 : i32, i32
  }
  func.func @transform_6(%arg0: i32) -> (i32, i32) {
    %c0_i32 = arith.constant 0 : i32
    %c0_i32_0 = arith.constant 0 : i32
    %c0_i32_1 = arith.constant 0 : i32
    return %c0_i32, %c0_i32_0 : i32, i32
  }
  func.func @transform_7(%arg0: i32) -> (i32, i32) {
    %c0_i32 = arith.constant 0 : i32
    %c0_i32_0 = arith.constant 0 : i32
    %c0_i32_1 = arith.constant 0 : i32
    return %c0_i32, %c0_i32_0 : i32, i32
  }
  func.func @transform_8(%arg0: i32) -> (i32, i32) {
    %c0_i32 = arith.constant 0 : i32
    %c0_i32_0 = arith.constant 0 : i32
    return %arg0, %c0_i32 : i32, i32
  }
}

</mosaic_0001>

<bundles_post_ra>
// kernel: tpu_custom_call.1
= control target key start
LH: loop header
LB: loop body
LE: loop exit
PB: predicated region body
PF: predicated region fallthrough
CT: control target
= control target key end

     0   :  { %s1029_s27 = smov 0   ;;  %s1100_s0 = inlined_call_operand.vmem [shape: bf16[256,32], index: 0, kind: input, shape index: {}]   ;;  %s1101_s1 = inlined_call_operand.vmem [shape: bf16[256,32], index: 1, kind: input, shape index: {}]   ;;  %s1102_s2 = inlined_call_operand.vmem [shape: bf16[32,32], index: 2, kind: input, shape index: {}]   ;;  %s1103_s3 = inlined_call_operand.vmem [shape: f32[1,32], index: 3, kind: input, shape index: {}]   ;;  %s1104_s4 = inlined_call_operand.vmem [shape: bf16[32,32], index: 4, kind: input, shape index: {}]   ;;  %s1105_s5 = inlined_call_operand.vmem [shape: f32[1,32], index: 5, kind: input, shape index: {}]   ;;  %s1106_s6 = inlined_call_operand.vmem [shape: bf16[32,4], index: 6, kind: input, shape index: {}]   ;;  %s1107_s7 = inlined_call_operand.vmem [shape: f32[1,4], index: 7, kind: input, shape index: {}]   ;;  %s1108_s8 = inlined_call_operand.vmem [shape: f32[256,4], index: 8, kind: output, shape index: {}]  }
   0x1 LB: > { %s826_s28 = sadd.s32 4294967295, %s982_s27   ;;  %p830_p0 = scmp.ge.s32.totalorder %s982_s27, 1  ;;  %s982_s27 = sphi %s1029_s27, %s18_s27  }
   0x2   : > { %p274_p1 = scmp.lt.s32.totalorder %s982_s27, 5 }
   0x4   : > { %p275_p2 = pnand %p830_p0, %p274_p1 }
   0x5   : > { %s831_s9 = sshll.u32 (!%p275_p2), %s826_s28, 3 }
   0x6   : > { %278 = sbr.rel (%p275_p2) target bundleno = 675 (0x2a3), region = 52  ;;  %p314_p3 = scmp.lt.s32.totalorder (!%p275_p2), %s831_s9, 31 }
   0xb   : > { %v938_v0 = vld [vmem:[%s1102_s2 + $0x8] sm:$0xff]   ;;  %v939_v1 = vld [vmem:[%s1102_s2] sm:$0xff]   ;;  %s1110_s9 = smov (!%p314_p3, %s831_s9), 31  ;;  %vm399_vm0 = vcmask 261120   ;;  %vm749_vm1 = vcmask 31744  }
   0xc   : > { %890 = vmatprep.subr.bf16.mxu0 %v938_v0  ;;  %926 = vmatprep.subr.bf16.mxu1 %v938_v0  ;;  %s832_s12 = sshll.u32 %s1110_s9, 2  ;;  %v940_v30 = vld [vmem:[%s1104_s4 + $0x8] sm:$0xff]   ;;  %v941_v31 = vld [vmem:[%s1104_s4] sm:$0xff]   ;;  %s836_s13 = sshll.u32 %s1110_s9, 3 }
   0xd   : > { %891 = vmatpush3.bf16.msra.mxu0 %v938_v0  ;;  %928 = vmatpush3.bf16.msra.mxu1 %v938_v0  ;;  %s317_s15 = scalar_lea.vmem %s1100_s0, %s832_s12  ;;  %s323_s18 = scalar_lea.vmem %s1101_s1, %s832_s12  ;;  %v837_v34 = vld [vmem:[%s1103_s3] ss:$0 sm:$0xff]  ;;  %v942_v61 = vld [vmem:[%s1106_s6 + $0x8] sm:$0xff]  }
   0xe   : > { %892 = vmatprep.subr.bf16.mxu0 %v939_v1  ;;  %927 = vmatprep.subr.bf16.mxu1 %v939_v1  ;;  %v332_v2 = vld [vmem:[%s317_s15] sm:$0xf]  ;;  %v333_v3 = vld [vmem:[%s317_s15 + $0x4] sm:$0xf]  ;;  %v334_v7 = vld [vmem:[%s317_s15 + $0x8] sm:$0xf]  ;;  %s329_s16 = scalar_lea.vmem %s1108_s8, %s836_s13 }
   0xf   : > { %v340_v4 = vld [vmem:[%s323_s18] sm:$0xf]  ;;  %v341_v5 = vld [vmem:[%s323_s18 + $0x4] sm:$0xf]  ;;  %v335_v8 = vld [vmem:[%s317_s15 + $0xc] sm:$0xf] }
  0x10   : > { %v348_v6 = vmul.bf16 %v340_v4, %v332_v2  ;;  %v349_v9 = vmul.bf16 %v341_v5, %v333_v3  ;;  %v342_v10 = vld [vmem:[%s323_s18 + $0x8] sm:$0xf]  ;;  %v343_v11 = vld [vmem:[%s323_s18 + $0xc] sm:$0xf]  ;;  %v336_v12 = vld [vmem:[%s317_s15 + $0x10] sm:$0xf] }
  0x11   : > { %893 = vmatpush3.bf16.msra.mxu0 %v939_v1  ;;  %929 = vmatpush3.bf16.msra.mxu1 %v939_v1  ;;  %v350_v13 = vmul.bf16 %v342_v10, %v334_v7  ;;  %v351_v14 = vmul.bf16 %v343_v11, %v335_v8  ;;  %v337_v15 = vld [vmem:[%s317_s15 + $0x14] sm:$0xf]  ;;  %v344_v16 = vld [vmem:[%s323_s18 + $0x10] sm:$0xf]  ;;  %v338_v21 = vld [vmem:[%s317_s15 + $0x18] sm:$0xf] }
  0x12   : > { %v345_v17 = vld [vmem:[%s323_s18 + $0x14] sm:$0xf]  ;;  %v838_v18 = vcombine.low %v348_v6, %v349_v9  ;;  %v352_v19 = vmul.bf16 %v344_v16, %v336_v12  ;;  %v339_v22 = vld [vmem:[%s317_s15 + $0x1c] sm:$0xf]  ;;  %v346_v23 = vld [vmem:[%s323_s18 + $0x18] sm:$0xf]  ;;  %902 = vmatprep.subr.bf16.mxu1 %v940_v30  ;;  %914 = vmatprep.subr.bf16.mxu0 %v942_v61 }
  0x13   : > { %v353_v20 = vmul.bf16 %v345_v17, %v337_v15  ;;  %v839_v24 = vcombine.low %v350_v13, %v351_v14  ;;  %v347_v25 = vld [vmem:[%s323_s18 + $0x1c] sm:$0xf]  ;;  %v354_v26 = vmul.bf16 %v346_v23, %v338_v21  ;;  %v943_v62 = vld [vmem:[%s1106_s6] sm:$0xff]  }
  0x14   : > { %894 = vmatprep.mubr.msk.bf16.mxu0 %vm399_vm0, %v838_v18  ;;  %v355_v28 = vmul.bf16 %v347_v25, %v339_v22  ;;  %v848_v1 = vld [vmem:[%s1105_s5] ss:$0 sm:$0xff] }
  0x15   : > { %v840_v27 = vcombine.low %v352_v19, %v353_v20  ;;  %895 = vmatmul.mubr.msk.bf16.vlgmr.msra.gmra.mxu0 %vm399_vm0, %v839_v24 }
  0x16   : > { %v841_v29 = vcombine.low %v354_v26, %v355_v28  ;;  %915 = vmatpush3.bf16.msra.mxu0 %v942_v61  ;;  %v855_v28 = vld [vmem:[%s1107_s7] ss:$0 sm:$0xff] }
  0x17   : > { %898 = vmatprep.mubr.msk.bf16.mxu1 %vm399_vm0, %v840_v27  ;;  %916 = vmatprep.subr.bf16.mxu0 %v943_v62 }
  0x18   : > { %899 = vmatmul.mubr.msk.bf16.vlgmr.msra.gmra.mxu1 %vm399_vm0, %v841_v29 }
  0x19   : > { %903 = vmatpush3.bf16.msra.mxu1 %v940_v30 }
  0x1a   : > { %904 = vmatprep.subr.bf16.mxu1 %v941_v31  ;;  %917 = vmatpush3.bf16.msra.mxu0 %v943_v62 }
  0x1d   : > { %905 = vmatpush3.bf16.msra.mxu1 %v941_v31 }
  0xd5   : > { %v896_v32 = vpop.f32.mrf.mxu0 }
  0xd6   : > { %v455_v40 = vadd.f32 %v896_v32, %v837_v34 }
  0xd7   : > { %v446_v33 = vpop.f32.mrf.mxu0 }
  0xd8   : > { %v900_v35 = vpop.f32.mrf.mxu1  ;;  %v447_v37 = vadd.f32 %v837_v34, %v446_v33  ;;  %v479_v49 = vmax.f32 %v455_v40, 0.0 }
  0xd9   : > { %v897_v36 = vpop.f32.mrf.mxu0  ;;  %v471_v53 = vadd.f32 %v900_v35, %v837_v34 }
  0xda   : > { %v458_v38 = vadd.f32 %v897_v36, %v837_v34  ;;  %v462_v39 = vpop.f32.mrf.mxu1  ;;  %v477_v46 = vmax.f32 %v447_v37, 0.0 }
  0xdb   : > { %v463_v41 = vadd.f32 %v837_v34, %v462_v39  ;;  %v449_v42 = vpop.f32.mrf.mxu0  ;;  %v483_v58 = vmax.f32 %v471_v53, 0.0 }
  0xdc   : > { %v450_v43 = vadd.f32 %v837_v34, %v449_v42  ;;  %v901_v44 = vpop.f32.mrf.mxu1  ;;  %v480_v45 = vmax.f32 %v458_v38, 0.0 }
  0xdd   : > { %v481_v50 = vmax.f32 %v463_v41, 0.0  ;;  %v474_v55 = vadd.f32 %v901_v44, %v837_v34 }
  0xde   : > { %v478_v47 = vmax.f32 %v450_v43, 0.0  ;;  %v465_v48 = vpop.f32.mrf.mxu1  ;;  %v486_v54 = vpack.c.bf16 %v480_v45, %v479_v49 }
  0xdf   : > { %v466_v51 = vadd.f32 %v837_v34, %v465_v48  ;;  %v484_v59 = vmax.f32 %v474_v55, 0.0 }
  0xe0   : > { %v485_v52 = vpack.c.bf16 %v478_v47, %v477_v46 }
  0xe1   : > { %v482_v56 = vmax.f32 %v466_v51, 0.0  ;;  %v488_v60 = vpack.c.bf16 %v484_v59, %v483_v58 }
  0xe2   : > { %906 = vmatprep.mubr.msk.bf16.mxu1 %vm399_vm0, %v485_v52 }
  0xe3   : > { %v487_v57 = vpack.c.bf16 %v482_v56, %v481_v50  ;;  %907 = vmatmul.mubr.msk.bf16.vlgmr.msra.gmra.mxu1 %vm399_vm0, %v486_v54 }
  0xe5   : > { %910 = vmatprep.mubr.msk.bf16.mxu1 %vm399_vm0, %v487_v57 }
  0xeb   : > { %911 = vmatmul.mubr.msk.bf16.gmra.mxu1 %vm399_vm0, %v488_v60 }
 0x1a3   : > { %v908_v63 = vpop.f32.mrf.mxu1 }
 0x1a4   : > { %v567_v5 = vadd.f32 %v908_v63, %v848_v1 }
 0x1a5   : > { %v558_v0 = vpop.f32.mrf.mxu1 }
 0x1a6   : > { %v559_v3 = vadd.f32 %v848_v1, %v558_v0  ;;  %v591_v12 = vmax.f32 %v567_v5, 0.0 }
 0x1a7   : > { %v909_v2 = vpop.f32.mrf.mxu1 }
 0x1a8   : > { %v570_v4 = vadd.f32 %v909_v2, %v848_v1  ;;  %v589_v10 = vmax.f32 %v559_v3, 0.0 }
 0x1a9   : > { %v561_v6 = vpop.f32.mrf.mxu1 }
 0x1aa   : > { %v562_v7 = vadd.f32 %v848_v1, %v561_v6  ;;  %v592_v8 = vmax.f32 %v570_v4, 0.0 }
 0x1ab   : > { %v912_v9 = vpop.f32.mrf.mxu1 }
 0x1ac   : > { %v590_v11 = vmax.f32 %v562_v7, 0.0  ;;  %v598_v15 = vpack.c.bf16 %v592_v8, %v591_v12  ;;  %v583_v19 = vadd.f32 %v912_v9, %v848_v1 }
 0x1ad   : > { %v574_v13 = vpop.f32.mrf.mxu1 }
 0x1ae   : > { %v597_v14 = vpack.c.bf16 %v590_v11, %v589_v10  ;;  %v575_v17 = vadd.f32 %v848_v1, %v574_v13  ;;  %v595_v25 = vmax.f32 %v583_v19, 0.0 }
 0x1af   : > { %v913_v16 = vpop.f32.mrf.mxu1 }
 0x1b0   : > { %v586_v18 = vadd.f32 %v913_v16, %v848_v1  ;;  %918 = vmatprep.mubr.msk.bf16.mxu0 %vm399_vm0, %v597_v14  ;;  %v593_v23 = vmax.f32 %v575_v17, 0.0 }
 0x1b1   : > { %v577_v20 = vpop.f32.mrf.mxu1  ;;  %919 = vmatmul.mubr.msk.bf16.vlgmr.msra.gmra.mxu0 %vm399_vm0, %v598_v15 }
 0x1b2   : > { %v578_v21 = vadd.f32 %v848_v1, %v577_v20  ;;  %v596_v22 = vmax.f32 %v586_v18, 0.0 }
 0x1b4   : > { %v594_v24 = vmax.f32 %v578_v21, 0.0  ;;  %v600_v27 = vpack.c.bf16 %v596_v22, %v595_v25 }
 0x1b6   : > { %v599_v26 = vpack.c.bf16 %v594_v24, %v593_v23 }
 0x1b8   : > { %922 = vmatprep.mubr.msk.bf16.mxu0 %vm399_vm0, %v599_v26 }
 0x1b9   : > { %923 = vmatmul.mubr.msk.bf16.gmra.mxu0 %vm399_vm0, %v600_v27 }
 0x271   : > { %v920_v29 = vpop.f32.mrf.mxu0 }
 0x272   : > { %v679_v30 = vadd.f32 %v920_v29, %v855_v28 }
 0x273   : > { %v670_v31 = vpop.f32.mrf.mxu0 }
 0x274   : > { %v864_v32 = vmul.f32 -1.442695, %v679_v30  ;;  %v671_v33 = vadd.f32 %v855_v28, %v670_v31 }
 0x275   : > { %v921_v34 = vpop.f32.mrf.mxu0 }
 0x276   : > { %944 = vpow2.f32 %v864_v32  ;;  %v862_v35 = vmul.f32 -1.442695, %v671_v33  ;;  %v682_v36 = vadd.f32 %v921_v34, %v855_v28 }
 0x277   : > { %v673_v37 = vpop.f32.mrf.mxu0 }
 0x278   : > { %946 = vpow2.f32 %v862_v35  ;;  %v865_v38 = vmul.f32 -1.442695, %v682_v36  ;;  %v674_v39 = vadd.f32 %v855_v28, %v673_v37 }
 0x279   : > { %v924_v40 = vpop.f32.mrf.mxu0 }
 0x27a   : > { %948 = vpow2.f32 %v865_v38  ;;  %v863_v41 = vmul.f32 -1.442695, %v674_v39  ;;  %v695_v42 = vadd.f32 %v924_v40, %v855_v28 }
 0x27b   : > { %v686_v43 = vpop.f32.mrf.mxu0 }
 0x27c   : > { %950 = vpow2.f32 %v863_v41  ;;  %v868_v44 = vmul.f32 -1.442695, %v695_v42  ;;  %v687_v45 = vadd.f32 %v855_v28, %v686_v43 }
 0x27d   : > { %v925_v46 = vpop.f32.mrf.mxu0 }
 0x27e   : > { %952 = vpow2.f32 %v868_v44  ;;  %v866_v47 = vmul.f32 -1.442695, %v687_v45  ;;  %v698_v48 = vadd.f32 %v925_v46, %v855_v28 }
 0x27f   : > { %v689_v49 = vpop.f32.mrf.mxu0 }
 0x280   : > { %954 = vpow2.f32 %v866_v47  ;;  %v869_v50 = vmul.f32 -1.442695, %v698_v48  ;;  %v690_v51 = vadd.f32 %v855_v28, %v689_v49 }
 0x282   : > { %956 = vpow2.f32 %v869_v50  ;;  %v867_v52 = vmul.f32 -1.442695, %v690_v51 }
 0x283   : > { %v945_v53 = vpop.eup %944 }
 0x284   : > { %v727_v54 = vadd.f32 1.0, %v945_v53  ;;  %958 = vpow2.f32 %v867_v52 }
 0x285   : > { %v947_v55 = vpop.eup %946 }
 0x286   : > { %960 = vrcp.f32 %v727_v54  ;;  %v725_v56 = vadd.f32 1.0, %v947_v55 }
 0x287   : > { %v949_v57 = vpop.eup %948 }
 0x288   : > { %962 = vrcp.f32 %v725_v56  ;;  %v728_v58 = vadd.f32 1.0, %v949_v57 }
 0x289   : > { %v951_v59 = vpop.eup %950 }
 0x28a   : > { %964 = vrcp.f32 %v728_v58  ;;  %v726_v60 = vadd.f32 1.0, %v951_v59 }
 0x28b   : > { %v953_v61 = vpop.eup %952 }
 0x28c   : > { %966 = vrcp.f32 %v726_v60  ;;  %v731_v62 = vadd.f32 1.0, %v953_v61 }
 0x28d   : > { %v955_v63 = vpop.eup %954 }
 0x28e   : > { %968 = vrcp.f32 %v731_v62  ;;  %v729_v0 = vadd.f32 1.0, %v955_v63 }
 0x28f   : > { %v957_v1 = vpop.eup %956 }
 0x290   : > { %970 = vrcp.f32 %v729_v0  ;;  %v732_v2 = vadd.f32 1.0, %v957_v1 }
 0x291   : > { %v959_v3 = vpop.eup %958 }
 0x292   : > { %972 = vrcp.f32 %v732_v2  ;;  %v730_v4 = vadd.f32 1.0, %v959_v3 }
 0x293   : > { %v961_v5 = vpop.eup %960 }
 0x294   : > { %752 = vst.msk [vmem:[%s329_s16 + $0x10] sm:$0xff] %vm749_vm1, %v961_v5  ;;  %974 = vrcp.f32 %v730_v4 }
 0x295   : > { %v963_v6 = vpop.eup %962 }
 0x296   : > { %750 = vst.msk [vmem:[%s329_s16] sm:$0xff] %vm749_vm1, %v963_v6 }
 0x297   : > { %v965_v7 = vpop.eup %964 }
 0x298   : > { %753 = vst.msk [vmem:[%s329_s16 + $0x18] sm:$0xff] %vm749_vm1, %v965_v7 }
 0x299   : > { %v967_v8 = vpop.eup %966 }
 0x29a   : > { %751 = vst.msk [vmem:[%s329_s16 + $0x8] sm:$0xff] %vm749_vm1, %v967_v8 }
 0x29b   : > { %v969_v9 = vpop.eup %968 }
 0x29c   : > { %756 = vst.msk [vmem:[%s329_s16 + $0x30] sm:$0xff] %vm749_vm1, %v969_v9 }
 0x29d   : > { %v971_v10 = vpop.eup %970 }
 0x29e   : > { %754 = vst.msk [vmem:[%s329_s16 + $0x20] sm:$0xff] %vm749_vm1, %v971_v10 }
 0x29f   : > { %v973_v11 = vpop.eup %972 }
 0x2a0   : > { %757 = vst.msk [vmem:[%s329_s16 + $0x38] sm:$0xff] %vm749_vm1, %v973_v11 }
 0x2a1   : > { %v975_v12 = vpop.eup %974 }
 0x2a2   : > { %755 = vst.msk [vmem:[%s329_s16 + $0x28] sm:$0xff] %vm749_vm1, %v975_v12 }
 0x2a3 PF: > { %s18_s27 = sadd.s32 1, %s982_s27  }
 0x2a4   : > { %p15_p4 = scmp.ge.s32.totalorder %s18_s27, 6  }
 0x2a6   :  { %17 = sbr.rel (!%p15_p4) target bundleno = 1 (0x1), region = 85 }

</bundles_post_ra>
